<compile_context>
chip_gen: v5e
topology: v5e:2x2
jax: 0.10.0
libtpu: 0.0.40
codegen_flags: <defaults>
</compile_context>

<pallas_src>
import functools

import jax
import jax.numpy as jnp
from jax.experimental import pallas as pl
from jax.experimental.pallas import tpu as pltpu


# ----------------------------------------------------------------------------
# Kernel: out_row[0, j] = <x[j, :], w_row[0, :]> + b   (fully folded network)
# ----------------------------------------------------------------------------
def _folded_affine_kernel(x_ref, w_ref, b_ref, o_ref):
    # x: (tile, F) f32, w: (1, F) f32, b: (1, 1) f32, o: (1, tile) f32.
    # Contract over F with the batch dim landing on lanes -> lane-dense output
    # row, no transpose/relayout of the result needed.
    s = jax.lax.dot_general(
        w_ref[...], x_ref[...],
        dimension_numbers=(((1,), (1,)), ((), ())),
        preferred_element_type=jnp.float32)              # (1, tile)
    o_ref[...] = (s + b_ref[...]).astype(o_ref.dtype)
    # TODO(synk): training-mode Dropout (stochastic masking) is intentionally
    # not modeled; forward here matches module.eval() semantics.


# ----------------------------------------------------------------------------
# Parameter fold (run ONCE at load time, outside the per-call jitted path).
# params hold transposed nn.Linear weights: w_i is (in, out), b_i is (1, out).
# ----------------------------------------------------------------------------
def fold_params(params):
    w = params["w1"]                       # (F, 1024)
    b = params["b1"]                       # (1, 1024)
    for i in range(2, 6):
        w = w @ params[f"w{i}"]
        b = b @ params[f"w{i}"] + params[f"b{i}"]
    w_row = jnp.transpose(w).astype(jnp.float32)          # (1, F)
    b_all = b.reshape(1, 1).astype(jnp.float32)           # (1, 1)
    return w_row, b_all


def _round_up(n, m):
    return ((n + m - 1) // m) * m


# ----------------------------------------------------------------------------
# Wrapper
# ----------------------------------------------------------------------------
@functools.partial(jax.jit, static_argnames=("batch_tile",))
def aesthetic_predictor(x, w_row, b_all, batch_tile=1024):
    """x: (B, F) f32.  w_row: (1, F) f32.  b_all: (1, 1) f32.  Returns (B, 1)."""
    B, F = x.shape

    # One large tile per step (multiple of 128 so the lane-dense output block
    # is always legal when the grid has several steps).  On v7x set
    # batch_tile ~= round_up(B/2, 256) so both TensorCores get one step.
    tile = min(batch_tile, _round_up(B, 128))
    grid = pl.cdiv(B, tile)

    out_row = pl.pallas_call(
        _folded_affine_kernel,
        out_shape=jax.ShapeDtypeStruct((1, grid * tile), jnp.float32),
        grid_spec=pltpu.PrefetchScalarGridSpec(
            num_scalar_prefetch=0,
            grid=(grid,),
            in_specs=[
                pl.BlockSpec((tile, F), lambda i: (i, 0)),   # x tile (streamed)
                pl.BlockSpec((1, F), lambda i: (0, 0)),      # folded weight row
                pl.BlockSpec((1, 1), lambda i: (0, 0)),      # folded bias
            ],
            out_specs=pl.BlockSpec((1, tile), lambda i: (0, i)),
        ),
        compiler_params=pltpu.CompilerParams(
            dimension_semantics=("parallel",)),
    )(x, w_row, b_all)

    # (1, grid*tile) row-major -> per-batch-row column; drop padded lanes.
    return out_row.reshape(-1, 1)[:B]


# ----------------------------------------------------------------------------
# Deterministic parameter construction (synthetic — mirrors nn.Linear shapes).
# PyTorch weight shape is (out, in); we store the transpose (in, out) plus a
# (1, out) bias row.
# ----------------------------------------------------------------------------
def init_params(input_size, key):
    dims = [(input_size, 1024), (1024, 128), (128, 64), (64, 16), (16, 1)]
    params = {}
    for idx, (fan_in, fan_out) in enumerate(dims, start=1):
        key, kw, kb = jax.random.split(key, 3)
        bound = 1.0 / (fan_in ** 0.5)
        w_pt = jax.random.uniform(kw, (fan_out, fan_in), jnp.float32,
                                  minval=-bound, maxval=bound)
        b_pt = jax.random.uniform(kb, (fan_out,), jnp.float32,
                                  minval=-bound, maxval=bound)
        params[f"w{idx}"] = jnp.transpose(w_pt)           # (in, out)
        params[f"b{idx}"] = b_pt.reshape(1, fan_out)      # (1, out)
    return params


def reference_forward(x, params):
    h = x
    for i in range(1, 6):
        h = h @ params[f"w{i}"] + params[f"b{i}"]
    return h


if __name__ == "__main__":
    key = jax.random.PRNGKey(0)
    k_x, k_p = jax.random.split(key)

    INPUT_SIZE = 256   # CLIP-style embedding size, kept small
    BATCH = 512

    # NOTE: if the upstream producer can emit x in bf16, pass it through
    # directly (do NOT add a wrapper-side cast) — the kernel is HBM-bound on
    # reading x, so halving that stream is the only remaining lever.
    x = jax.random.normal(k_x, (BATCH, INPUT_SIZE), jnp.float32)
    params = init_params(INPUT_SIZE, k_p)

    # Fold once at load time (hoisted out of the per-call jitted path).
    w_row, b_all = fold_params(params)

    out = aesthetic_predictor(x, w_row, b_all)
    out = jax.block_until_ready(out)

    ref = reference_forward(x, params)
    assert out.shape == (BATCH, 1), out.shape
    # Full fold stays in f32, so only association order differs vs. the
    # layer-by-layer f32 reference — tolerance can be tight.
    assert jnp.allclose(out, ref, atol=1e-3, rtol=1e-3), (
        float(jnp.max(jnp.abs(out - ref))))

    print("KERNEL_OK")
</pallas_src>

<mosaic_0001>
module attributes {stable_mosaic.version = 11 : i64} {
  func.func @_folded_affine_kernel(%arg0: i32, %arg1: memref<512x256xf32, #tpu.memory_space<vmem>>, %arg2: memref<1x256xf32, #tpu.memory_space<vmem>>, %arg3: memref<1x1xf32, #tpu.memory_space<vmem>>, %arg4: memref<1x512xf32, #tpu.memory_space<vmem>>) attributes {dimension_semantics = [#tpu.dimension_semantics<parallel>], iteration_bounds = array<i64: 1>, scalar_prefetch = 0 : i64, scratch_operands = 0 : i64, tpu.core_type = #tpu.core_type<tc>, window_params = [{transform_indices = @transform_0, window_bounds = array<i64: 512, 256>}, {pipeline_mode = #tpu.pipeline_mode<synchronous>, transform_indices = @transform_1, window_bounds = array<i64: 1, 256>}, {pipeline_mode = #tpu.pipeline_mode<synchronous>, transform_indices = @transform_2, window_bounds = array<i64: 1, 1>}, {transform_indices = @transform_3, window_bounds = array<i64: 1, 512>}]} {
    %c0 = arith.constant 0 : index
    %c0_0 = arith.constant 0 : index
    %0 = vector.load %arg2[%c0, %c0_0] : memref<1x256xf32, #tpu.memory_space<vmem>>, vector<1x256xf32>
    %c0_1 = arith.constant 0 : index
    %c0_2 = arith.constant 0 : index
    %1 = vector.load %arg1[%c0_1, %c0_2] : memref<512x256xf32, #tpu.memory_space<vmem>>, vector<512x256xf32>
    %cst = arith.constant dense<0.000000e+00> : vector<1x512xf32>
    %2 = tpu.matmul %0, %1, %cst {dimension_numbers = #tpu.dot_dimension_numbers<[1], [1], [0], [0], [0, 0, 1, 0], [], []>} : vector<1x256xf32>, vector<512x256xf32>, vector<1x512xf32> -> vector<1x512xf32>
    %c0_3 = arith.constant 0 : index
    %c0_4 = arith.constant 0 : index
    %3 = vector.load %arg3[%c0_3, %c0_4] : memref<1x1xf32, #tpu.memory_space<vmem>>, vector<1x1xf32>
    %4 = vector.broadcast %3 : vector<1x1xf32> to vector<1x512xf32>
    %5 = arith.addf %2, %4 : vector<1x512xf32>
    %c0_5 = arith.constant 0 : index
    %c0_6 = arith.constant 0 : index
    %6 = vector.load %arg4[%c0_5, %c0_6] : memref<1x512xf32, #tpu.memory_space<vmem>>, vector<1x512xf32>
    tpu.vector_store %arg4[%c0_5, %c0_6], %5 {strides = array<i32>} : memref<1x512xf32, #tpu.memory_space<vmem>>, vector<1x512xf32>,
    return
  }
  func.func @transform_0(%arg0: i32) -> (i32, i32) {
    %c0_i32 = arith.constant 0 : i32
    %c0_i32_0 = arith.constant 0 : i32
    return %arg0, %c0_i32 : i32, i32
  }
  func.func @transform_1(%arg0: i32) -> (i32, i32) {
    %c0_i32 = arith.constant 0 : i32
    %c0_i32_0 = arith.constant 0 : i32
    %c0_i32_1 = arith.constant 0 : i32
    return %c0_i32, %c0_i32_0 : i32, i32
  }
  func.func @transform_2(%arg0: i32) -> (i32, i32) {
    %c0_i32 = arith.constant 0 : i32
    %c0_i32_0 = arith.constant 0 : i32
    %c0_i32_1 = arith.constant 0 : i32
    return %c0_i32, %c0_i32_0 : i32, i32
  }
  func.func @transform_3(%arg0: i32) -> (i32, i32) {
    %c0_i32 = arith.constant 0 : i32
    %c0_i32_0 = arith.constant 0 : i32
    return %c0_i32, %arg0 : i32, i32
  }
}

</mosaic_0001>

<bundles_post_ra>
// kernel: aesthetic_predictor.1
= control target key start
LH: loop header
LB: loop body
LE: loop exit
PB: predicated region body
PF: predicated region fallthrough
CT: control target
= control target key end

     0   :  { %s477_s0 = inlined_call_operand.hbm [shape: f32[512,256], index: 0, kind: input, shape index: {}]   ;;  %s478_s1 = inlined_call_operand.vmem [shape: f32[1,256], index: 1, kind: input, shape index: {}]   ;;  %s479_s2 = inlined_call_operand.<no memory space> [shape: f32[1,1], index: 2, kind: input, shape index: {}]   ;;  %s480_s3 = inlined_call_operand.hbm [shape: f32[1,512], index: 3, kind: output, shape index: {}]  }
   0x1   :  { %v8_v0 = vstv %s479_s2 }
   0x2   :  { %9 = vst [vmem:[#allocation2] sm:$0x1] %v8_v0 }
   0x3   :  { %10 = vsyncpa [#allocation4], 0 }
   0x4   :  { %11 = vsyncpa [#allocation5], 0  ;;  %s16_s16 = sshll.u32 %s477_s0, 4  ;;  %s428_s17 = smov [#allocation3]   ;;  %s17_s16 = int_to_ptr.hbm [resolvable:$true] %s16_s16 }
   0x5   :  { %s18_s18 = sshll.u32 %s428_s17, 4  ;;  %s429_s19 = smov 256   ;;  %s19_s18 = int_to_ptr.vmem [resolvable:$true] %s18_s18 }
   0x6   :  { %s430_s20 = smov 16  }
   0x7   :  { %24 = dma.hbm_to_vmem [thread:$0]  %s17_s16, 16384, %s19_s18, [#allocation4], %s429_s19, %s429_s19, %s430_s20  }
   0x8   :  { %424 = dma.done.wait [#allocation4], 16384  }
   0x9   :  { %425 = vsyncadd [#allocation4], 4294950912  ;;  %v96_v1 = vld [vmem:[#allocation3 + $0x1f0] sm:$0xff]  ;;  %v97_v2 = vld [vmem:[#allocation3 + $0x1f8] sm:$0xff]  ;;  %vm341_vm0 = vcmask 1040384   ;;  %vm343_vm1 = vcmask 1042434  }
   0xa   :  { %214 = vmatpush.xpose.msra.mxu2 %v96_v1  ;;  %234 = vmatpush.xpose.msra.mxu3 %v97_v2  ;;  %v64_v3 = vld [vmem:[#allocation3 + $0xf0] sm:$0xff]  ;;  %v65_v4 = vld [vmem:[#allocation3 + $0xf8] sm:$0xff]  ;;  %v94_v5 = vld [vmem:[#allocation3 + $0x1e0] sm:$0xff]  ;;  %s360_s24 = sshll.u32 %s480_s3, 4  ;;  %vm345_vm2 = vcmask 1041408   ;;  %s361_s24 = int_to_ptr.hbm [resolvable:$true] %s360_s24 }
   0xb   :  { %174 = vmatpush.xpose.msra.mxu0 %v64_v3  ;;  %v95_v6 = vld [vmem:[#allocation3 + $0x1e8] sm:$0xff]  ;;  %194 = vmatpush.xpose.msra.mxu1 %v65_v4  ;;  %v62_v7 = vld [vmem:[#allocation3 + $0xe0] sm:$0xff]  ;;  %v92_v9 = vld [vmem:[#allocation3 + $0x1d0] sm:$0xff] }
   0xc   :  { %v63_v8 = vld [vmem:[#allocation3 + $0xe8] sm:$0xff]  ;;  %v93_v10 = vld [vmem:[#allocation3 + $0x1d8] sm:$0xff]  ;;  %v60_v11 = vld [vmem:[#allocation3 + $0xd0] sm:$0xff] }
   0xd   :  { %v61_v12 = vld [vmem:[#allocation3 + $0xd8] sm:$0xff]  ;;  %v90_v13 = vld [vmem:[#allocation3 + $0x1c0] sm:$0xff]  ;;  %v91_v14 = vld [vmem:[#allocation3 + $0x1c8] sm:$0xff] }
   0xe   :  { %215 = vmatpush.xpose.msra.mxu2 %v94_v5  ;;  %235 = vmatpush.xpose.msra.mxu3 %v95_v6  ;;  %v58_v15 = vld [vmem:[#allocation3 + $0xc0] sm:$0xff]  ;;  %v59_v16 = vld [vmem:[#allocation3 + $0xc8] sm:$0xff]  ;;  %v88_v17 = vld [vmem:[#allocation3 + $0x1b0] sm:$0xff] }
   0xf   :  { %175 = vmatpush.xpose.msra.mxu0 %v62_v7  ;;  %195 = vmatpush.xpose.msra.mxu1 %v63_v8  ;;  %v89_v18 = vld [vmem:[#allocation3 + $0x1b8] sm:$0xff]  ;;  %v56_v19 = vld [vmem:[#allocation3 + $0xb0] sm:$0xff]  ;;  %v86_v21 = vld [vmem:[#allocation3 + $0x1a0] sm:$0xff] }
  0x10   :  { %v57_v20 = vld [vmem:[#allocation3 + $0xb8] sm:$0xff]  ;;  %v87_v22 = vld [vmem:[#allocation3 + $0x1a8] sm:$0xff]  ;;  %v54_v23 = vld [vmem:[#allocation3 + $0xa0] sm:$0xff] }
  0x11   :  { %v55_v24 = vld [vmem:[#allocation3 + $0xa8] sm:$0xff]  ;;  %v84_v25 = vld [vmem:[#allocation3 + $0x190] sm:$0xff]  ;;  %v85_v26 = vld [vmem:[#allocation3 + $0x198] sm:$0xff] }
  0x12   :  { %216 = vmatpush.xpose.msra.mxu2 %v92_v9  ;;  %236 = vmatpush.xpose.msra.mxu3 %v93_v10  ;;  %v52_v27 = vld [vmem:[#allocation3 + $0x90] sm:$0xff]  ;;  %v53_v28 = vld [vmem:[#allocation3 + $0x98] sm:$0xff]  ;;  %v82_v29 = vld [vmem:[#allocation3 + $0x180] sm:$0xff] }
  0x13   :  { %176 = vmatpush.xpose.msra.mxu0 %v60_v11  ;;  %196 = vmatpush.xpose.msra.mxu1 %v61_v12  ;;  %v83_v30 = vld [vmem:[#allocation3 + $0x188] sm:$0xff]  ;;  %v50_v31 = vld [vmem:[#allocation3 + $0x80] sm:$0xff]  ;;  %v80_v33 = vld [vmem:[#allocation3 + $0x170] sm:$0xff] }
  0x14   :  { %v51_v32 = vld [vmem:[#allocation3 + $0x88] sm:$0xff]  ;;  %v81_v34 = vld [vmem:[#allocation3 + $0x178] sm:$0xff]  ;;  %v48_v35 = vld [vmem:[#allocation3 + $0x70] sm:$0xff] }
  0x15   :  { %v49_v36 = vld [vmem:[#allocation3 + $0x78] sm:$0xff]  ;;  %v78_v37 = vld [vmem:[#allocation3 + $0x160] sm:$0xff]  ;;  %v79_v38 = vld [vmem:[#allocation3 + $0x168] sm:$0xff] }
  0x16   :  { %217 = vmatpush.xpose.msra.mxu2 %v90_v13  ;;  %237 = vmatpush.xpose.msra.mxu3 %v91_v14  ;;  %v46_v39 = vld [vmem:[#allocation3 + $0x60] sm:$0xff]  ;;  %v47_v40 = vld [vmem:[#allocation3 + $0x68] sm:$0xff]  ;;  %v76_v41 = vld [vmem:[#allocation3 + $0x150] sm:$0xff] }
  0x17   :  { %177 = vmatpush.xpose.msra.mxu0 %v58_v15  ;;  %197 = vmatpush.xpose.msra.mxu1 %v59_v16  ;;  %v77_v42 = vld [vmem:[#allocation3 + $0x158] sm:$0xff]  ;;  %v44_v43 = vld [vmem:[#allocation3 + $0x50] sm:$0xff]  ;;  %v74_v45 = vld [vmem:[#allocation3 + $0x140] sm:$0xff] }
  0x18   :  { %v45_v44 = vld [vmem:[#allocation3 + $0x58] sm:$0xff]  ;;  %v75_v46 = vld [vmem:[#allocation3 + $0x148] sm:$0xff]  ;;  %v42_v47 = vld [vmem:[#allocation3 + $0x40] sm:$0xff] }
  0x19   :  { %v43_v48 = vld [vmem:[#allocation3 + $0x48] sm:$0xff]  ;;  %v72_v49 = vld [vmem:[#allocation3 + $0x130] sm:$0xff]  ;;  %v73_v50 = vld [vmem:[#allocation3 + $0x138] sm:$0xff] }
  0x1a   :  { %218 = vmatpush.xpose.msra.mxu2 %v88_v17  ;;  %238 = vmatpush.xpose.msra.mxu3 %v89_v18  ;;  %v40_v51 = vld [vmem:[#allocation3 + $0x30] sm:$0xff]  ;;  %v41_v52 = vld [vmem:[#allocation3 + $0x38] sm:$0xff]  ;;  %v70_v53 = vld [vmem:[#allocation3 + $0x120] sm:$0xff] }
  0x1b   :  { %178 = vmatpush.xpose.msra.mxu0 %v56_v19  ;;  %198 = vmatpush.xpose.msra.mxu1 %v57_v20  ;;  %v71_v54 = vld [vmem:[#allocation3 + $0x128] sm:$0xff]  ;;  %v38_v55 = vld [vmem:[#allocation3 + $0x20] sm:$0xff]  ;;  %v68_v57 = vld [vmem:[#allocation3 + $0x110] sm:$0xff] }
  0x1c   :  { %v39_v56 = vld [vmem:[#allocation3 + $0x28] sm:$0xff]  ;;  %v69_v58 = vld [vmem:[#allocation3 + $0x118] sm:$0xff]  ;;  %v36_v59 = vld [vmem:[#allocation3 + $0x10] sm:$0xff] }
  0x1d   :  { %v37_v60 = vld [vmem:[#allocation3 + $0x18] sm:$0xff]  ;;  %v66_v61 = vld [vmem:[#allocation3 + $0x100] sm:$0xff]  ;;  %v67_v62 = vld [vmem:[#allocation3 + $0x108] sm:$0xff] }
  0x1e   :  { %219 = vmatpush.xpose.msra.mxu2 %v86_v21  ;;  %239 = vmatpush.xpose.msra.mxu3 %v87_v22  ;;  %v160_v63 = vld [vmem:[#allocation3 + $0x3f0] sm:$0xff]  ;;  %v161_v0 = vld [vmem:[#allocation3 + $0x3f8] sm:$0xff]  ;;  %v34_v1 = vld [vmem:[#allocation3] sm:$0xff] }
  0x1f   :  { %179 = vmatpush.xpose.msra.mxu0 %v54_v23  ;;  %199 = vmatpush.xpose.msra.mxu1 %v55_v24  ;;  %v35_v2 = vld [vmem:[#allocation3 + $0x8] sm:$0xff]  ;;  %v128_v3 = vld [vmem:[#allocation3 + $0x2f0] sm:$0xff]  ;;  %v129_v4 = vld [vmem:[#allocation3 + $0x2f8] sm:$0xff] }
  0x20   :  { %v158_v5 = vld [vmem:[#allocation3 + $0x3e0] sm:$0xff]  ;;  %v159_v6 = vld [vmem:[#allocation3 + $0x3e8] sm:$0xff]  ;;  %v156_v9 = vld [vmem:[#allocation3 + $0x3d0] sm:$0xff] }
  0x21   :  { %v126_v7 = vld [vmem:[#allocation3 + $0x2e0] sm:$0xff]  ;;  %v127_v8 = vld [vmem:[#allocation3 + $0x2e8] sm:$0xff]  ;;  %v157_v10 = vld [vmem:[#allocation3 + $0x3d8] sm:$0xff] }
  0x22   :  { %220 = vmatpush.xpose.msra.mxu2 %v84_v25  ;;  %240 = vmatpush.xpose.msra.mxu3 %v85_v26  ;;  %v124_v11 = vld [vmem:[#allocation3 + $0x2d0] sm:$0xff]  ;;  %v125_v12 = vld [vmem:[#allocation3 + $0x2d8] sm:$0xff]  ;;  %v154_v13 = vld [vmem:[#allocation3 + $0x3c0] sm:$0xff] }
  0x23   :  { %180 = vmatpush.xpose.msra.mxu0 %v52_v27  ;;  %200 = vmatpush.xpose.msra.mxu1 %v53_v28  ;;  %v155_v14 = vld [vmem:[#allocation3 + $0x3c8] sm:$0xff]  ;;  %v122_v15 = vld [vmem:[#allocation3 + $0x2c0] sm:$0xff]  ;;  %v152_v17 = vld [vmem:[#allocation3 + $0x3b0] sm:$0xff] }
  0x24   :  { %v123_v16 = vld [vmem:[#allocation3 + $0x2c8] sm:$0xff]  ;;  %v153_v18 = vld [vmem:[#allocation3 + $0x3b8] sm:$0xff]  ;;  %v120_v19 = vld [vmem:[#allocation3 + $0x2b0] sm:$0xff] }
  0x25   :  { %v121_v20 = vld [vmem:[#allocation3 + $0x2b8] sm:$0xff]  ;;  %v150_v21 = vld [vmem:[#allocation3 + $0x3a0] sm:$0xff]  ;;  %v151_v22 = vld [vmem:[#allocation3 + $0x3a8] sm:$0xff] }
  0x26   :  { %221 = vmatpush.xpose.msra.mxu2 %v82_v29  ;;  %241 = vmatpush.xpose.msra.mxu3 %v83_v30  ;;  %v33_v23 = vld [vmem:[%s478_s1] sm:$0x3]  ;;  %v119_v25 = vld [vmem:[#allocation3 + $0x2a8] sm:$0xff]  ;;  %v148_v28 = vld [vmem:[#allocation3 + $0x390] sm:$0xff]  ;;  %s432_s1 = smov [#allocation6]  }
  0x27   :  { %181 = vmatpush.xpose.msra.mxu0 %v50_v31  ;;  %201 = vmatpush.xpose.msra.mxu1 %v51_v32  ;;  %v118_v24 = vld [vmem:[#allocation3 + $0x2a0] sm:$0xff]  ;;  %v462_v26 = vperm.slane %v33_v23, 0  ;;  %v464_v27 = vperm.slane %v33_v23, 1  ;;  %v149_v29 = vld [vmem:[#allocation3 + $0x398] sm:$0xff]  ;;  %v116_v30 = vld [vmem:[#allocation3 + $0x290] sm:$0xff]  ;;  %s358_s21 = sshll.u32 %s432_s1, 4  ;;  %s359_s21 = int_to_ptr.vmem [resolvable:$true] %s358_s21 }
  0x28   :  { %v117_v31 = vld [vmem:[#allocation3 + $0x298] sm:$0xff]  ;;  %v146_v32 = vld [vmem:[#allocation3 + $0x380] sm:$0xff] }
  0x2a   :  { %222 = vmatpush.xpose.msra.mxu2 %v80_v33  ;;  %242 = vmatpush.xpose.msra.mxu3 %v81_v34  ;;  %v147_v33 = vld [vmem:[#allocation3 + $0x388] sm:$0xff]  ;;  %v114_v34 = vld [vmem:[#allocation3 + $0x280] sm:$0xff] }
  0x2b   :  { %182 = vmatpush.xpose.msra.mxu0 %v48_v35  ;;  %202 = vmatpush.xpose.msra.mxu1 %v49_v36  ;;  %v115_v35 = vld [vmem:[#allocation3 + $0x288] sm:$0xff]  ;;  %v144_v36 = vld [vmem:[#allocation3 + $0x370] sm:$0xff] }
  0x2e   :  { %223 = vmatpush.xpose.msra.mxu2 %v78_v37  ;;  %243 = vmatpush.xpose.msra.mxu3 %v79_v38  ;;  %v145_v37 = vld [vmem:[#allocation3 + $0x378] sm:$0xff]  ;;  %v112_v38 = vld [vmem:[#allocation3 + $0x270] sm:$0xff] }
  0x2f   :  { %183 = vmatpush.xpose.msra.mxu0 %v46_v39  ;;  %203 = vmatpush.xpose.msra.mxu1 %v47_v40  ;;  %v113_v39 = vld [vmem:[#allocation3 + $0x278] sm:$0xff] }
  0x30   :  { %v162_v40 = vld [vmem:[#allocation2] sm:$0x1] }
  0x32   :  { %224 = vmatpush.xpose.msra.mxu2 %v76_v41  ;;  %244 = vmatpush.xpose.msra.mxu3 %v77_v42  ;;  %v142_v41 = vld [vmem:[#allocation3 + $0x360] sm:$0xff]  ;;  %v143_v42 = vld [vmem:[#allocation3 + $0x368] sm:$0xff] }
  0x33   :  { %184 = vmatpush.xpose.msra.mxu0 %v44_v43  ;;  %204 = vmatpush.xpose.msra.mxu1 %v45_v44  ;;  %v431_v43 = vmov 0   ;;  %v110_v44 = vld [vmem:[#allocation3 + $0x260] sm:$0xff] }
  0x34   :  { %375 = vset.pattern.permute.xlu0 %v431_v43 }
  0x35   :  { %165 = vperm.xlu0 %375, %v162_v40  }
  0x36   :  { %225 = vmatpush.xpose.msra.mxu2 %v74_v45  ;;  %245 = vmatpush.xpose.msra.mxu3 %v75_v46  ;;  %v111_v45 = vld [vmem:[#allocation3 + $0x268] sm:$0xff]  ;;  %v140_v46 = vld [vmem:[#allocation3 + $0x350] sm:$0xff] }
  0x37   :  { %185 = vmatpush.xpose.msra.mxu0 %v42_v47  ;;  %205 = vmatpush.xpose.msra.mxu1 %v43_v48  ;;  %v141_v47 = vld [vmem:[#allocation3 + $0x358] sm:$0xff]  ;;  %v108_v48 = vld [vmem:[#allocation3 + $0x250] sm:$0xff] }
  0x3a   :  { %226 = vmatpush.xpose.msra.mxu2 %v72_v49  ;;  %246 = vmatpush.xpose.msra.mxu3 %v73_v50  ;;  %v109_v49 = vld [vmem:[#allocation3 + $0x258] sm:$0xff]  ;;  %v138_v50 = vld [vmem:[#allocation3 + $0x340] sm:$0xff] }
  0x3b   :  { %186 = vmatpush.xpose.msra.mxu0 %v40_v51  ;;  %206 = vmatpush.xpose.msra.mxu1 %v41_v52  ;;  %v139_v51 = vld [vmem:[#allocation3 + $0x348] sm:$0xff]  ;;  %v106_v52 = vld [vmem:[#allocation3 + $0x240] sm:$0xff] }
  0x3e   :  { %227 = vmatpush.xpose.msra.mxu2 %v70_v53  ;;  %247 = vmatpush.xpose.msra.mxu3 %v71_v54  ;;  %v107_v53 = vld [vmem:[#allocation3 + $0x248] sm:$0xff]  ;;  %v136_v54 = vld [vmem:[#allocation3 + $0x330] sm:$0xff] }
  0x3f   :  { %187 = vmatpush.xpose.msra.mxu0 %v38_v55  ;;  %207 = vmatpush.xpose.msra.mxu1 %v39_v56  ;;  %v137_v55 = vld [vmem:[#allocation3 + $0x338] sm:$0xff]  ;;  %v104_v56 = vld [vmem:[#allocation3 + $0x230] sm:$0xff] }
  0x42   :  { %228 = vmatpush.xpose.msra.mxu2 %v68_v57  ;;  %248 = vmatpush.xpose.msra.mxu3 %v69_v58  ;;  %v105_v57 = vld [vmem:[#allocation3 + $0x238] sm:$0xff]  ;;  %v134_v58 = vld [vmem:[#allocation3 + $0x320] sm:$0xff] }
  0x43   :  { %188 = vmatpush.xpose.msra.mxu0 %v36_v59  ;;  %208 = vmatpush.xpose.msra.mxu1 %v37_v60  ;;  %v135_v59 = vld [vmem:[#allocation3 + $0x328] sm:$0xff]  ;;  %v102_v60 = vld [vmem:[#allocation3 + $0x220] sm:$0xff] }
  0x46   :  { %229 = vmatpush.xpose.msra.mxu2 %v66_v61  ;;  %249 = vmatpush.xpose.msra.mxu3 %v67_v62  ;;  %v103_v61 = vld [vmem:[#allocation3 + $0x228] sm:$0xff]  ;;  %v132_v62 = vld [vmem:[#allocation3 + $0x310] sm:$0xff] }
  0x47   :  { %189 = vmatpush.xpose.msra.mxu0 %v34_v1  ;;  %209 = vmatpush.xpose.msra.mxu1 %v35_v2  ;;  %v101_v1 = vld [vmem:[#allocation3 + $0x218] sm:$0xff]  ;;  %v130_v2 = vld [vmem:[#allocation3 + $0x300] sm:$0xff] }
  0x49   :  { %230 = vmatmul.f32.vlgmr.msra.gmra.mxu2 %v462_v26  ;;  %250 = vmatmul.f32.vlgmr.msra.gmra.mxu3 %v464_v27 }
  0x4a   :  { %294 = vmatpush.xpose.msrb.mxu2 %v160_v63  ;;  %314 = vmatpush.xpose.msrb.mxu3 %v161_v0  ;;  %v133_v63 = vld [vmem:[#allocation3 + $0x318] sm:$0xff]  ;;  %v100_v0 = vld [vmem:[#allocation3 + $0x210] sm:$0xff] }
  0x4b   :  { %254 = vmatpush.xpose.msrb.mxu0 %v128_v3  ;;  %274 = vmatpush.xpose.msrb.mxu1 %v129_v4  ;;  %v131_v3 = vld [vmem:[#allocation3 + $0x308] sm:$0xff]  ;;  %v98_v4 = vld [vmem:[#allocation3 + $0x200] sm:$0xff] }
  0x4c   :  { %190 = vmatmul.f32.vlgmr.msra.gmra.mxu0 %v462_v26  ;;  %210 = vmatmul.f32.vlgmr.msra.gmra.mxu1 %v464_v27 }
  0x4e   :  { %295 = vmatpush.xpose.msrb.mxu2 %v158_v5  ;;  %315 = vmatpush.xpose.msrb.mxu3 %v159_v6  ;;  %v99_v5 = vld [vmem:[#allocation3 + $0x208] sm:$0xff] }
  0x4f   :  { %255 = vmatpush.xpose.msrb.mxu0 %v126_v7  ;;  %275 = vmatpush.xpose.msrb.mxu1 %v127_v8 }
  0x52   :  { %296 = vmatpush.xpose.msrb.mxu2 %v156_v9  ;;  %316 = vmatpush.xpose.msrb.mxu3 %v157_v10 }
  0x53   :  { %256 = vmatpush.xpose.msrb.mxu0 %v124_v11  ;;  %276 = vmatpush.xpose.msrb.mxu1 %v125_v12 }
  0x56   :  { %297 = vmatpush.xpose.msrb.mxu2 %v154_v13  ;;  %317 = vmatpush.xpose.msrb.mxu3 %v155_v14 }
  0x57   :  { %257 = vmatpush.xpose.msrb.mxu0 %v122_v15  ;;  %277 = vmatpush.xpose.msrb.mxu1 %v123_v16 }
  0x5a   :  { %298 = vmatpush.xpose.msrb.mxu2 %v152_v17  ;;  %318 = vmatpush.xpose.msrb.mxu3 %v153_v18 }
  0x5b   :  { %258 = vmatpush.xpose.msrb.mxu0 %v120_v19  ;;  %278 = vmatpush.xpose.msrb.mxu1 %v121_v20 }
  0x5e   :  { %299 = vmatpush.xpose.msrb.mxu2 %v150_v21  ;;  %319 = vmatpush.xpose.msrb.mxu3 %v151_v22  ;;  %v348_v22 = vlaneseq }
  0x5f   :  { %259 = vmatpush.xpose.msrb.mxu0 %v118_v24  ;;  %279 = vmatpush.xpose.msrb.mxu1 %v119_v25 }
  0x60   :  { %vm350_vm3 = vcmp.lt.s32.totalorder %v348_v22, 512 }
  0x62   :  { %300 = vmatpush.xpose.msrb.mxu2 %v148_v28  ;;  %320 = vmatpush.xpose.msrb.mxu3 %v149_v29 }
  0x63   :  { %260 = vmatpush.xpose.msrb.mxu0 %v116_v30  ;;  %280 = vmatpush.xpose.msrb.mxu1 %v117_v31 }
  0x66   :  { %301 = vmatpush.xpose.msrb.mxu2 %v146_v32  ;;  %321 = vmatpush.xpose.msrb.mxu3 %v147_v33 }
  0x67   :  { %261 = vmatpush.xpose.msrb.mxu0 %v114_v34  ;;  %281 = vmatpush.xpose.msrb.mxu1 %v115_v35 }
  0x6a   :  { %302 = vmatpush.xpose.msrb.mxu2 %v144_v36  ;;  %322 = vmatpush.xpose.msrb.mxu3 %v145_v37 }
  0x6b   :  { %262 = vmatpush.xpose.msrb.mxu0 %v112_v38  ;;  %282 = vmatpush.xpose.msrb.mxu1 %v113_v39 }
  0x6e   :  { %303 = vmatpush.xpose.msrb.mxu2 %v142_v41  ;;  %323 = vmatpush.xpose.msrb.mxu3 %v143_v42 }
  0x6f   :  { %263 = vmatpush.xpose.msrb.mxu0 %v110_v44  ;;  %283 = vmatpush.xpose.msrb.mxu1 %v111_v45 }
  0x72   :  { %304 = vmatpush.xpose.msrb.mxu2 %v140_v46  ;;  %324 = vmatpush.xpose.msrb.mxu3 %v141_v47 }
  0x73   :  { %264 = vmatpush.xpose.msrb.mxu0 %v108_v48  ;;  %284 = vmatpush.xpose.msrb.mxu1 %v109_v49 }
  0x76   :  { %305 = vmatpush.xpose.msrb.mxu2 %v138_v50  ;;  %325 = vmatpush.xpose.msrb.mxu3 %v139_v51 }
  0x77   :  { %265 = vmatpush.xpose.msrb.mxu0 %v106_v52  ;;  %285 = vmatpush.xpose.msrb.mxu1 %v107_v53 }
  0x7a   :  { %306 = vmatpush.xpose.msrb.mxu2 %v136_v54  ;;  %326 = vmatpush.xpose.msrb.mxu3 %v137_v55 }
  0x7b   :  { %266 = vmatpush.xpose.msrb.mxu0 %v104_v56  ;;  %286 = vmatpush.xpose.msrb.mxu1 %v105_v57 }
  0x7e   :  { %307 = vmatpush.xpose.msrb.mxu2 %v134_v58  ;;  %327 = vmatpush.xpose.msrb.mxu3 %v135_v59 }
  0x7f   :  { %267 = vmatpush.xpose.msrb.mxu0 %v102_v60  ;;  %287 = vmatpush.xpose.msrb.mxu1 %v103_v61 }
  0x82   :  { %308 = vmatpush.xpose.msrb.mxu2 %v132_v62  ;;  %328 = vmatpush.xpose.msrb.mxu3 %v133_v63 }
  0x83   :  { %268 = vmatpush.xpose.msrb.mxu0 %v100_v0  ;;  %288 = vmatpush.xpose.msrb.mxu1 %v101_v1 }
  0x86   :  { %309 = vmatpush.xpose.msrb.mxu2 %v130_v2  ;;  %329 = vmatpush.xpose.msrb.mxu3 %v131_v3 }
  0x87   :  { %269 = vmatpush.xpose.msrb.mxu0 %v98_v4  ;;  %289 = vmatpush.xpose.msrb.mxu1 %v99_v5 }
  0x89   :  { %310 = vmatmul.f32.vlgmr.msrb.gmra.mxu2 %v462_v26  ;;  %330 = vmatmul.f32.vlgmr.msrb.gmra.mxu3 %v464_v27 }
  0x8a   :  { %270 = vmatmul.f32.vlgmr.msrb.gmra.mxu0 %v462_v26  ;;  %290 = vmatmul.f32.vlgmr.msrb.gmra.mxu1 %v464_v27 }
  0xa7   :  { %v166_v8 = vpop.permute.xlu0 %165 }
  0xa8   :  { %v168_v9 = vperm.slane %v166_v8, 0 }
  0xc9   :  { %v191_v6 = vpop.f32.mrf.mxu0  ;;  %v211_v7 = vpop.f32.mrf.mxu1 }
  0xca   :  { %v192_v16 = vadd.f32 %v191_v6, %v168_v9 }
  0xcc   :  { %v231_v10 = vpop.f32.mrf.mxu2  ;;  %v251_v11 = vpop.f32.mrf.mxu3  ;;  %v212_v24 = vadd.f32 %v211_v7, %v192_v16 }
  0xcd   :  { %v232_v12 = vadd.f32 %v231_v10, %v168_v9 }
  0xcf   :  { %v252_v17 = vadd.f32 %v251_v11, %v232_v12 }
  0xd1   :  { %v338_v23 = vrot.slane %v252_v17, 7 }
  0xd3   :  { %v342_v28 = vsel %vm341_vm0, %v212_v24, %v338_v23 }
 0x107   :  { %v271_v13 = vpop.f32.mrf.mxu0  ;;  %v291_v14 = vpop.f32.mrf.mxu1 }
 0x108   :  { %v272_v15 = vadd.f32 %v271_v13, %v168_v9 }
 0x10a   :  { %v292_v18 = vadd.f32 %v291_v14, %v272_v15 }
 0x10c   :  { %v311_v19 = vpop.f32.mrf.mxu2  ;;  %v331_v20 = vpop.f32.mrf.mxu3  ;;  %v339_v25 = vrot.slane %v292_v18, 6 }
 0x10d   :  { %v312_v21 = vadd.f32 %v311_v19, %v168_v9 }
 0x10f   :  { %v332_v26 = vadd.f32 %v331_v20, %v312_v21 }
 0x111   :  { %v340_v27 = vrot.slane %v332_v26, 5 }
 0x113   :  { %v344_v29 = vsel %vm343_vm1, %v339_v25, %v340_v27 }
 0x114   :  { %v346_v30 = vsel %vm345_vm2, %v342_v28, %v344_v29 }
 0x115   :  { %352 = vst.msk [vmem:[#allocation6] sm:$0xf] %vm350_vm3, %v346_v30 }
 0x116   :  { %363 = dma.vmem_to_hbm [thread:$0]  %s359_s21, 64, %s361_s24, [#allocation5]  }
 0x117   :  { %426 = dma.done.wait [#allocation5], 64  }
 0x118   :  { %427 = vsyncadd [#allocation5], 4294967232 }
 0x119   :  { %368 = vsyncpa [#allocation4], 1 }
 0x11a   :  { %369 = vsyncpa [#allocation5], 1 }

</bundles_post_ra>
